<compile_context>
chip_gen: v7x
topology: tpu7x:2x2x1
jax: 0.10.0
libtpu: 0.0.40
codegen_flags: <defaults>
</compile_context>

<pallas_src>
import functools

import jax
import jax.numpy as jnp
from jax.experimental import pallas as pl
from jax.experimental.pallas import tpu as pltpu


def _sigmoid(x):
    # sigmoid(x) == 0.5 * (tanh(0.5*x) + 1): single EUP tanh push vs exp +
    # full-precision divide; trims the elementwise epilogue.
    return 0.5 * (jnp.tanh(0.5 * x) + 1.0)


def _apply_nonlin(x, nonlin):
    """Nonlinearity on f32 values inside the kernel."""
    if nonlin == "tanh":
        return jnp.tanh(x)
    if nonlin == "softmax":
        # Numerically stable softmax over the feature (lane) dim. The feature
        # dim is never split across grid tiles, so this reduction is safe.
        m = jnp.max(x, axis=-1, keepdims=True)
        e = jnp.exp(x - m)
        denom = jnp.sum(e, axis=-1, keepdims=True)
        return e * pl.reciprocal(denom, approx=True)  # EUP slot, ~free
    if nonlin == "sigmoid":
        return _sigmoid(x)
    return x  # '' -> identity


def _rational_cell_kernel(inp_ref, state_ref, w_ref, b_ref, out_ref,
                          *, nonlin, hidden_dim):
    # inp_ref: (TB, D) in matmul dtype (bf16, cast in the wrapper).
    # w_ref:   (D, 2H) bf16, pre-transposed/pre-cast in the wrapper, so the
    #          contraction is the canonical (1,)x(0,) form: no per-tile
    #          transpose, no per-grid-step cast of constant data.
    logits = jnp.dot(inp_ref[...], w_ref[...],
                     preferred_element_type=jnp.float32)
    logits = logits + b_ref[...]                              # (TB, 2H), f32

    inp_rep = _apply_nonlin(logits[:, :hidden_dim], nonlin)   # (TB, H)
    forget_gate = _sigmoid(logits[:, hidden_dim:])            # (TB, H)

    state = state_ref[...].astype(jnp.float32)
    # fg*state + (1-fg)*inp_rep  ==  inp_rep + fg*(state - inp_rep)
    new_state = inp_rep + forget_gate * (state - inp_rep)
    out_ref[...] = new_state.astype(out_ref.dtype)


def _pick_batch_tile(B, block_b):
    """Batch tile: multiple of 16 (bf16 packing), >= 2 grid steps when B > 16."""
    if B <= 16:
        return B  # full-array block; a single grid step is unavoidable here
    tb = min(block_b, B)
    tb = max(16, tb - tb % 16)
    # grid=(1,) disables the BlockSpec pipeline (no DMA/compute overlap), so
    # halve the tile until we get at least 2 steps.
    while tb > 16 and pl.cdiv(B, tb) < 2:
        half = tb // 2
        tb = max(16, half - half % 16)
    return tb


def _vmem_cap_bytes():
    """Generation-aware cap for the scoped VMEM limit."""
    try:
        phys = int(pltpu.get_tpu_info().vmem_capacity_bytes)
    except Exception:
        phys = 64 * 1024 * 1024  # conservative fallback: v7x per-TC size
    if phys <= 64 * 1024 * 1024:
        return 56 * 1024 * 1024    # v7x: 64 MiB physical per TC
    return 100 * 1024 * 1024       # v5e / v6e: 128 MiB physical


def rational_cell(inp, state, w_in, b_in, w_f, b_f, nonlin="",
                  block_b=512, matmul_dtype=jnp.bfloat16):
    """inp: (B, D), state: (B, H); weights in PyTorch (out, in) convention."""
    B, D = inp.shape
    H = state.shape[-1]
    assert w_in.shape == (H, D), f"w_in shape {w_in.shape} != {(H, D)}"
    assert w_f.shape == (H, H), f"w_f shape {w_f.shape} != {(H, H)}"
    # The module applies forget_tr (hidden->hidden) to `inp`: fail loudly.
    assert D == H, f"RationalCell requires input_dim == hidden_dim ({D} vs {H})"

    out_dtype = state.dtype
    H2 = 2 * H

    # Fuse the two linears (same LHS) into one weight, pre-transposed to
    # (D, 2H) (lane-dense output dim) and pre-cast to bf16 in HBM. In a
    # recurrent loop this prep must be hoisted out of the hot path.
    w_cat = jnp.concatenate([w_in.T, w_f.T], axis=1).astype(matmul_dtype)  # (D, 2H)
    b_cat = jnp.concatenate([b_in, b_f], axis=0).reshape(1, H2)
    b_cat = b_cat.astype(jnp.float32)

    # Pre-cast the activations fed to the MXU; state stays in its own dtype.
    inp_mx = inp.astype(matmul_dtype)

    tb = _pick_batch_tile(B, block_b)
    grid = (pl.cdiv(B, tb),)
    # NOTE(v7x): an even grid length balances the two TensorCores best; the
    # "parallel" semantic still shards whatever length we get.

    # VMEM budget: double-buffered activation/output tiles, resident weight
    # (1 or 2 buffers depending on Buffered(1) support), f32 logits + gating
    # intermediates. Only raise the scoped limit when it would not fit the
    # smallest default (16 MiB on v5e); cap generation-dependently.
    mx_bytes = jnp.dtype(matmul_dtype).itemsize
    st_bytes = jnp.dtype(state.dtype).itemsize
    out_bytes = jnp.dtype(out_dtype).itemsize

    def _needed(weight_bufs):
        return (2 * tb * D * mx_bytes            # inp tiles (double-buffered)
                + 2 * tb * H * st_bytes          # state tiles
                + 2 * tb * H * out_bytes         # output tiles
                + weight_bufs * D * H2 * mx_bytes  # resident fused weight
                + weight_bufs * H2 * 4             # resident fused bias
                + tb * H2 * 4                      # f32 logits intermediate
                + 2 * tb * H * 4)                  # inp_rep / gate temporaries

    kernel = functools.partial(_rational_cell_kernel,
                               nonlin=nonlin, hidden_dim=H)

    def _launch(single_buffer_weights):
        weight_kw = {}
        if single_buffer_weights:
            # Constant index_map: no need to double-buffer the residents.
            weight_kw = dict(pipeline_mode=pl.Buffered(1))
        needed = _needed(1 if single_buffer_weights else 2)
        vmem_limit = None
        if needed > 16 * 1024 * 1024:
            vmem_limit = min(max(int(needed * 3 // 2), 32 * 1024 * 1024),
                             _vmem_cap_bytes())
        return pl.pallas_call(
            kernel,
            out_shape=jax.ShapeDtypeStruct((B, H), out_dtype),
            grid=grid,
            in_specs=[
                pl.BlockSpec((tb, D), lambda i: (i, 0)),   # inp tile (pipelined)
                pl.BlockSpec((tb, H), lambda i: (i, 0)),   # state tile (pipelined)
                pl.BlockSpec((D, H2), lambda i: (0, 0), **weight_kw),  # resident weight
                pl.BlockSpec((1, H2), lambda i: (0, 0), **weight_kw),  # resident bias
            ],
            out_specs=pl.BlockSpec((tb, H), lambda i: (i, 0)),
            compiler_params=pltpu.CompilerParams(
                dimension_semantics=("parallel",),
                vmem_limit_bytes=vmem_limit,
            ),
        )(inp_mx, state, w_cat, b_cat)

    try:
        return _launch(True)
    except Exception:
        # Fallback for JAX versions where Buffered(1) on a BlockSpec is not
        # accepted; genuine kernel errors will re-raise from this second call.
        return _launch(False)


def rational_cell_ref(inp, state, w_in, b_in, w_f, b_f, nonlin=""):
    """Pure-JAX f32 reference mirroring the PyTorch forward."""
    def nl(x):
        if nonlin == "tanh":
            return jnp.tanh(x)
        if nonlin == "softmax":
            return jax.nn.softmax(x, axis=-1)
        if nonlin == "sigmoid":
            return jax.nn.sigmoid(x)
        return x
    inp_rep = nl(inp @ w_in.T + b_in)
    fg = jax.nn.sigmoid(inp @ w_f.T + b_f)
    return fg * state + (1.0 - fg) * inp_rep


if __name__ == "__main__":
    # Lane-dense hidden (multiple of 128); input_dim == hidden_dim as the
    # module requires. Batch tiled into 2 grid steps (TB = 16).
    B, D, H = 32, 128, 128

    key = jax.random.PRNGKey(0)
    k_inp, k_state, k_wi, k_bi, k_wf, k_bf = jax.random.split(key, 6)

    inp = jax.random.normal(k_inp, (B, D), dtype=jnp.float32)
    state = jax.random.normal(k_state, (B, H), dtype=jnp.float32)

    # nn.Linear-style init: U(-1/sqrt(fan_in), 1/sqrt(fan_in))
    bound_in = 1.0 / jnp.sqrt(jnp.float32(D))
    w_in = jax.random.uniform(k_wi, (H, D), jnp.float32, -bound_in, bound_in)
    b_in = jax.random.uniform(k_bi, (H,), jnp.float32, -bound_in, bound_in)

    bound_f = 1.0 / jnp.sqrt(jnp.float32(H))
    w_f = jax.random.uniform(k_wf, (H, H), jnp.float32, -bound_f, bound_f)
    b_f = jax.random.uniform(k_bf, (H,), jnp.float32, -bound_f, bound_f)

    for nonlin in ("", "tanh", "sigmoid", "softmax"):
        out = rational_cell(inp, state, w_in, b_in, w_f, b_f, nonlin=nonlin)
        out = jax.block_until_ready(out)
        ref = rational_cell_ref(inp, state, w_in, b_in, w_f, b_f, nonlin=nonlin)
        assert out.shape == (B, H)
        # bf16 MXU operands (f32 accumulation/gating) vs pure-f32 reference.
        assert jnp.allclose(out, ref, atol=2e-2, rtol=2e-2), \
            f"mismatch vs reference for nonlin={nonlin!r}"

    print("KERNEL_OK")
</pallas_src>

<mosaic_0001>
module attributes {stable_mosaic.version = 11 : i64} {
  func.func @_rational_cell_kernel(%arg0: i32, %arg1: memref<16x128xbf16, #tpu.memory_space<vmem>>, %arg2: memref<16x128xf32, #tpu.memory_space<vmem>>, %arg3: memref<128x256xbf16, #tpu.memory_space<vmem>>, %arg4: memref<1x256xf32, #tpu.memory_space<vmem>>, %arg5: memref<16x128xf32, #tpu.memory_space<vmem>>) attributes {dimension_semantics = [#tpu.dimension_semantics<parallel>], iteration_bounds = array<i64: 2>, scalar_prefetch = 0 : i64, scratch_operands = 0 : i64, tpu.core_type = #tpu.core_type<tc>, window_params = [{transform_indices = @transform_0, window_bounds = array<i64: 16, 128>}, {transform_indices = @transform_1, window_bounds = array<i64: 16, 128>}, {pipeline_mode = #tpu.pipeline_mode<synchronous>, transform_indices = @transform_2, window_bounds = array<i64: 128, 256>}, {pipeline_mode = #tpu.pipeline_mode<synchronous>, transform_indices = @transform_3, window_bounds = array<i64: 1, 256>}, {transform_indices = @transform_4, window_bounds = array<i64: 16, 128>}]} {
    %c0 = arith.constant 0 : index
    %c0_0 = arith.constant 0 : index
    %0 = vector.load %arg1[%c0, %c0_0] : memref<16x128xbf16, #tpu.memory_space<vmem>>, vector<16x128xbf16>
    %c0_1 = arith.constant 0 : index
    %c0_2 = arith.constant 0 : index
    %1 = vector.load %arg3[%c0_1, %c0_2] : memref<128x256xbf16, #tpu.memory_space<vmem>>, vector<128x256xbf16>
    %cst = arith.constant dense<0.000000e+00> : vector<16x256xf32>
    %2 = tpu.matmul %0, %1, %cst {dimension_numbers = #tpu.dot_dimension_numbers<[1], [0], [0], [1], [0, 0, 1, 1], [], []>} : vector<16x128xbf16>, vector<128x256xbf16>, vector<16x256xf32> -> vector<16x256xf32>
    %c0_3 = arith.constant 0 : index
    %c0_4 = arith.constant 0 : index
    %3 = vector.load %arg4[%c0_3, %c0_4] : memref<1x256xf32, #tpu.memory_space<vmem>>, vector<1x256xf32>
    %4 = vector.broadcast %3 : vector<1x256xf32> to vector<16x256xf32>
    %5 = arith.addf %2, %4 : vector<16x256xf32>
    %6 = vector.extract_strided_slice %5 {offsets = [0, 0], sizes = [16, 128], strides = [1, 1]} : vector<16x256xf32> to vector<16x128xf32>
    %7 = vector.extract_strided_slice %5 {offsets = [0, 128], sizes = [16, 128], strides = [1, 1]} : vector<16x256xf32> to vector<16x128xf32>
    %cst_5 = arith.constant 5.000000e-01 : f32
    %8 = vector.broadcast %cst_5 : f32 to vector<16x128xf32>
    %9 = arith.mulf %8, %7 : vector<16x128xf32>
    %10 = math.tanh %9 : vector<16x128xf32>
    %cst_6 = arith.constant 1.000000e+00 : f32
    %11 = vector.broadcast %cst_6 : f32 to vector<16x128xf32>
    %12 = arith.addf %10, %11 : vector<16x128xf32>
    %cst_7 = arith.constant 5.000000e-01 : f32
    %13 = vector.broadcast %cst_7 : f32 to vector<16x128xf32>
    %14 = arith.mulf %13, %12 : vector<16x128xf32>
    %c0_8 = arith.constant 0 : index
    %c0_9 = arith.constant 0 : index
    %15 = vector.load %arg2[%c0_8, %c0_9] : memref<16x128xf32, #tpu.memory_space<vmem>>, vector<16x128xf32>
    %16 = arith.subf %15, %6 : vector<16x128xf32>
    %17 = arith.mulf %14, %16 : vector<16x128xf32>
    %18 = arith.addf %6, %17 : vector<16x128xf32>
    %c0_10 = arith.constant 0 : index
    %c0_11 = arith.constant 0 : index
    %19 = vector.load %arg5[%c0_10, %c0_11] : memref<16x128xf32, #tpu.memory_space<vmem>>, vector<16x128xf32>
    tpu.vector_store %arg5[%c0_10, %c0_11], %18 {strides = array<i32>} : memref<16x128xf32, #tpu.memory_space<vmem>>, vector<16x128xf32>,
    return
  }
  func.func @transform_0(%arg0: i32) -> (i32, i32) {
    %c0_i32 = arith.constant 0 : i32
    %c0_i32_0 = arith.constant 0 : i32
    return %arg0, %c0_i32 : i32, i32
  }
  func.func @transform_1(%arg0: i32) -> (i32, i32) {
    %c0_i32 = arith.constant 0 : i32
    %c0_i32_0 = arith.constant 0 : i32
    return %arg0, %c0_i32 : i32, i32
  }
  func.func @transform_2(%arg0: i32) -> (i32, i32) {
    %c0_i32 = arith.constant 0 : i32
    %c0_i32_0 = arith.constant 0 : i32
    %c0_i32_1 = arith.constant 0 : i32
    return %c0_i32, %c0_i32_0 : i32, i32
  }
  func.func @transform_3(%arg0: i32) -> (i32, i32) {
    %c0_i32 = arith.constant 0 : i32
    %c0_i32_0 = arith.constant 0 : i32
    %c0_i32_1 = arith.constant 0 : i32
    return %c0_i32, %c0_i32_0 : i32, i32
  }
  func.func @transform_4(%arg0: i32) -> (i32, i32) {
    %c0_i32 = arith.constant 0 : i32
    %c0_i32_0 = arith.constant 0 : i32
    return %arg0, %c0_i32 : i32, i32
  }
}

module attributes {stable_mosaic.version = 11 : i64} {
  func.func @_rational_cell_kernel(%arg0: i32, %arg1: memref<16x128xbf16, #tpu.memory_space<vmem>>, %arg2: memref<16x128xf32, #tpu.memory_space<vmem>>, %arg3: memref<128x256xbf16, #tpu.memory_space<vmem>>, %arg4: memref<1x256xf32, #tpu.memory_space<vmem>>, %arg5: memref<16x128xf32, #tpu.memory_space<vmem>>) attributes {dimension_semantics = [#tpu.dimension_semantics<parallel>], iteration_bounds = array<i64: 2>, scalar_prefetch = 0 : i64, scratch_operands = 0 : i64, tpu.core_type = #tpu.core_type<tc>, window_params = [{transform_indices = @transform_0, window_bounds = array<i64: 16, 128>}, {transform_indices = @transform_1, window_bounds = array<i64: 16, 128>}, {pipeline_mode = #tpu.pipeline_mode<synchronous>, transform_indices = @transform_2, window_bounds = array<i64: 128, 256>}, {pipeline_mode = #tpu.pipeline_mode<synchronous>, transform_indices = @transform_3, window_bounds = array<i64: 1, 256>}, {transform_indices = @transform_4, window_bounds = array<i64: 16, 128>}]} {
    %c0 = arith.constant 0 : index
    %c0_0 = arith.constant 0 : index
    %0 = vector.load %arg1[%c0, %c0_0] : memref<16x128xbf16, #tpu.memory_space<vmem>>, vector<16x128xbf16>
    %c0_1 = arith.constant 0 : index
    %c0_2 = arith.constant 0 : index
    %1 = vector.load %arg3[%c0_1, %c0_2] : memref<128x256xbf16, #tpu.memory_space<vmem>>, vector<128x256xbf16>
    %cst = arith.constant dense<0.000000e+00> : vector<16x256xf32>
    %2 = tpu.matmul %0, %1, %cst {dimension_numbers = #tpu.dot_dimension_numbers<[1], [0], [0], [1], [0, 0, 1, 1], [], []>} : vector<16x128xbf16>, vector<128x256xbf16>, vector<16x256xf32> -> vector<16x256xf32>
    %c0_3 = arith.constant 0 : index
    %c0_4 = arith.constant 0 : index
    %3 = vector.load %arg4[%c0_3, %c0_4] : memref<1x256xf32, #tpu.memory_space<vmem>>, vector<1x256xf32>
    %4 = vector.broadcast %3 : vector<1x256xf32> to vector<16x256xf32>
    %5 = arith.addf %2, %4 : vector<16x256xf32>
    %6 = vector.extract_strided_slice %5 {offsets = [0, 0], sizes = [16, 128], strides = [1, 1]} : vector<16x256xf32> to vector<16x128xf32>
    %7 = vector.extract_strided_slice %5 {offsets = [0, 128], sizes = [16, 128], strides = [1, 1]} : vector<16x256xf32> to vector<16x128xf32>
    %cst_5 = arith.constant 5.000000e-01 : f32
    %8 = vector.broadcast %cst_5 : f32 to vector<16x128xf32>
    %9 = arith.mulf %8, %7 : vector<16x128xf32>
    %10 = math.tanh %9 : vector<16x128xf32>
    %cst_6 = arith.constant 1.000000e+00 : f32
    %11 = vector.broadcast %cst_6 : f32 to vector<16x128xf32>
    %12 = arith.addf %10, %11 : vector<16x128xf32>
    %cst_7 = arith.constant 5.000000e-01 : f32
    %13 = vector.broadcast %cst_7 : f32 to vector<16x128xf32>
    %14 = arith.mulf %13, %12 : vector<16x128xf32>
    %c0_8 = arith.constant 0 : index
    %c0_9 = arith.constant 0 : index
    %15 = vector.load %arg2[%c0_8, %c0_9] : memref<16x128xf32, #tpu.memory_space<vmem>>, vector<16x128xf32>
    %16 = arith.subf %15, %6 : vector<16x128xf32>
    %17 = arith.mulf %14, %16 : vector<16x128xf32>
    %18 = arith.addf %6, %17 : vector<16x128xf32>
    %c0_10 = arith.constant 0 : index
    %c0_11 = arith.constant 0 : index
    %19 = vector.load %arg5[%c0_10, %c0_11] : memref<16x128xf32, #tpu.memory_space<vmem>>, vector<16x128xf32>
    tpu.vector_store %arg5[%c0_10, %c0_11], %18 {strides = array<i32>} : memref<16x128xf32, #tpu.memory_space<vmem>>, vector<16x128xf32>,
    return
  }
  func.func @transform_0(%arg0: i32) -> (i32, i32) {
    %c0_i32 = arith.constant 0 : i32
    %c0_i32_0 = arith.constant 0 : i32
    return %arg0, %c0_i32 : i32, i32
  }
  func.func @transform_1(%arg0: i32) -> (i32, i32) {
    %c0_i32 = arith.constant 0 : i32
    %c0_i32_0 = arith.constant 0 : i32
    return %arg0, %c0_i32 : i32, i32
  }
  func.func @transform_2(%arg0: i32) -> (i32, i32) {
    %c0_i32 = arith.constant 0 : i32
    %c0_i32_0 = arith.constant 0 : i32
    %c0_i32_1 = arith.constant 0 : i32
    return %c0_i32, %c0_i32_0 : i32, i32
  }
  func.func @transform_3(%arg0: i32) -> (i32, i32) {
    %c0_i32 = arith.constant 0 : i32
    %c0_i32_0 = arith.constant 0 : i32
    %c0_i32_1 = arith.constant 0 : i32
    return %c0_i32, %c0_i32_0 : i32, i32
  }
  func.func @transform_4(%arg0: i32) -> (i32, i32) {
    %c0_i32 = arith.constant 0 : i32
    %c0_i32_0 = arith.constant 0 : i32
    return %arg0, %c0_i32 : i32, i32
  }
}

</mosaic_0001>

<bundles_post_ra>
// kernel: tpu_custom_call.1
= control target key start
LH: loop header
LB: loop body
LE: loop exit
PB: predicated region body
PF: predicated region fallthrough
CT: control target
= control target key end

     0   :  { %s1174_s0 = inlined_call_operand.hbm [shape: bf16[32,128], index: 0, kind: input, shape index: {}]   ;;  %s1175_s1 = inlined_call_operand.hbm [shape: f32[32,128], index: 1, kind: input, shape index: {}]   ;;  %s1176_s2 = inlined_call_operand.hbm [shape: bf16[128,256], index: 2, kind: input, shape index: {}]   ;;  %s1177_s3 = inlined_call_operand.vmem [shape: f32[1,256], index: 3, kind: input, shape index: {}]   ;;  %s1178_s4 = inlined_call_operand.hbm [shape: f32[32,128], index: 4, kind: output, shape index: {}]  }
   0x1   :  { %1184 = sst [smem:[#allocation13_spill]] %s1174_s0 }
   0x2   :  { %1185 = sst [smem:[#allocation14_spill]] %s1176_s2 }
   0x3   :  { %9 = vsyncpa [#allocation3], 0 }
   0x4   :  { %11 = vsyncpa [#allocation3 + $0x1], 0 }
   0x5   :  { %12 = vsyncpa [#allocation6], 0 }
   0x6   :  { %14 = vsyncpa [#allocation6 + $0x1], 0 }
   0x7   :  { %15 = vsyncpa [#allocation4], 0 }
   0x8   :  { %17 = vsyncpa [#allocation4 + $0x1], 0  ;;  %s908_s15 = smov 0   ;;  %s910_s16 = smov 0  }
   0x9   :  { %s912_s17 = smov 0   ;;  %s914_s18 = smov 0  }
   0xa LB: > { %s929_s19 = sadd.s32 4294967295, %s870_s18   ;;  %s570_s20 = sadd.s32 4294967294, %s870_s18   ;;  %s870_s18 = sphi %s914_s18, %s1206_s18   ;;  %s866_s17 = sphi %s912_s17, %s1205_s17   ;;  %s862_s16 = sphi %s910_s16, %s1204_s16   ;;  %s858_s15 = sphi %s908_s15, %s1203_s15  }
   0xb   : > { %p43_p0 = scmp.ne.s32.totalorder %s862_s16, %s858_s15  ;;  %p1179_p1 = scmp.eq.s32.totalorder %s929_s19, 0 }
   0xc   : > { %p141_p3 = scmp.eq.s32.totalorder %s570_s20, 1  ;;  %p571_p5 = scmp.ge.s32.totalorder %s870_s18, 1 }
   0xd   : > { %p938_p4 = por %p1179_p1, %p43_p0  ;;  %p148_p7 = scmp.lt.s32.totalorder %s870_s18, 3 }
   0xe   : > { %p943_p6 = por %p141_p3, %p43_p0  ;;  %s872_s24 = smov [#allocation7]  }
   0xf   : > { %s1186_s21 = scalar_select %p938_p4, 1, 0 }
  0x10   : > { %s1187_s22 = scalar_select %p943_p6, 1, 0 }
  0x11   : > { %p948_p8 = pnand %p571_p5, %p148_p7  ;;  %s160_s25 = sshll.u32 %s872_s24, 4  ;;  %s952_s25 = int_to_ptr.vmem [resolvable:$true] %s160_s25 }
  0x12   : > { %s964_s27 = sadd.s32 1, %s870_s18   ;;  %s30_s28 = sadd.s32 1, %s866_s17 }
  0x13   : > { %s1188_s23 = scalar_select %p948_p8, 1, 0 }
  0x14   : > { %p620_p9 = pneg %p948_p8  ;;  %s27_s29 = ssub.s32 %s870_s18, %s964_s27 }
  0x15   : > { %s1190_s2 = sld [smem:[#allocation14_spill]] }
  0x16   : > { %p959_p11 = pnand %p620_p9, %p1179_p1 }
  0x18   : > { %p710_p13 = pneg %p959_p11 }
  0x1b   : > { %s708_s6 = scalar_lea.hbm %s1190_s2, 2048 }
  0x1c   : > { %p709_p12 = scmp.ne.s32.totalorder %s1190_s2, %s708_s6  ;;  %p715_p5 = scmp.lt.u32.totalorder %s708_s6, %s1190_s2 }
  0x1e   : > { %p711_p0 = pnand %p710_p13, %p709_p12 }
  0x20   : > { %p712_p3 = pneg %p711_p0 }
  0x22   : > { %p717_p7 = pnand %p715_p5, %p712_p3 }
  0x24   : > { %720 = shalt.err (!%p717_p7)
}
  0x25   : > { %s721_s11 = scalar_lea.vmem %s952_s25, 2048  ;;  %p729_p2 = scmp.lt.s32.totalorder %s952_s25, %s952_s25 }
  0x26   : > { %p722_p9 = scmp.ne.s32.totalorder %s952_s25, %s721_s11  ;;  %p730_p6 = scmp.lt.s32.totalorder %s721_s11, %s721_s11 }
  0x28   : > { %p724_p10 = pnand %p722_p9, %p710_p13  ;;  %p731_p4 = por %p730_p6, %p729_p2 }
  0x2a   : > { %p725_p1 = pneg %p724_p10 }
  0x2c   : > { %p732_p8 = pnand %p731_p4, %p725_p1 }
  0x2e   : > { %735 = shalt.err (!%p732_p8)
}
  0x2f   : > { %s1182_s12 = smov 128   ;;  %s1183_s13 = smov 8  }
  0x30   : > { %623 = dma.hbm_to_vmem [thread:$0]  (!%p959_p11), %s1190_s2, 2048, %s952_s25, [#allocation6], %s1182_s12, %s1182_s12, %s1183_s13  }
  0x31   : > { %p28_p1 = scmp.eq.s32.totalorder %s27_s29, 0  ;;  %p37_p2 = scmp.ne.s32.totalorder %s866_s17, %s862_s16 }
  0x32   : > { %p38_p4 = scmp.eq.s32.totalorder %s870_s18, 0  ;;  %p636_p6 = scmp.lt.s32.totalorder %s870_s18, 2 }
  0x33   : > { %s998_s24 = scalar_select %p28_p1, %s866_s17, %s30_s28  }
  0x34   : > { %p39_p8 = por %p38_p4, %p37_p2  ;;  %p1191_p10 = scmp.eq.s32.totalorder %s929_s19, 1 }
  0x35   : > { %s1007_s26 = sand.u32 1, %s866_s17   ;;  %s607_s5 = sshll.u32 %s870_s18, 7 }
  0x36   : > { %p1002_p12 = por %p1191_p10, %p37_p2  ;;  %s574_s6 = sshll.u32 %s1007_s26, 3 }
  0x37   : > { %s1193_s0 = sld [smem:[#allocation13_spill]]  ;;  %s181_s28 = scalar_lea.vmem [#allocation2], %s574_s6 }
  0x38   : > { %s188_s8 = sshll.u32 %s181_s28, 4  ;;  %p1016_p11 = pnand %p636_p6, %p39_p8  ;;  %s1020_s8 = int_to_ptr.vmem [resolvable:$true] %s188_s8 }
  0x39   : > { %s178_s10 = scalar_lea.sflag [#allocation3], %s1007_s26 }
  0x3a   : > { %p738_p0 = pneg %p1016_p11 }
  0x3d   : > { %s1014_s29 = scalar_lea.hbm %s1193_s0, %s607_s5  ;;  %s741_s5 = scalar_lea.hbm %s1193_s0, 256 }
  0x3e   : > { %s736_s11 = scalar_lea.hbm %s1014_s29, 128  ;;  %p742_p7 = scmp.lt.u32.totalorder %s1014_s29, %s1193_s0 }
  0x3f   : > { %p737_p13 = scmp.ne.s32.totalorder %s1014_s29, %s736_s11  ;;  %p743_p9 = scmp.lt.u32.totalorder %s741_s5, %s736_s11 }
  0x40   : > { %p745_p2 = scmp.lt.u32.totalorder %s736_s11, %s1014_s29 }
  0x41   : > { %p739_p3 = pnand %p738_p0, %p737_p13  ;;  %p744_p1 = por %p743_p9, %p742_p7 }
  0x43   : > { %p740_p5 = pneg %p739_p3  ;;  %p746_p4 = por %p745_p2, %p744_p1 }
  0x45   : > { %p747_p6 = pnand %p746_p4, %p740_p5 }
  0x47   : > { %750 = shalt.err (!%p747_p6)
}
  0x48   : > { %s751_s25 = scalar_lea.vmem %s1020_s8, 128  ;;  %s875_s28 = smov [#allocation2]  }
  0x49   : > { %p752_p8 = scmp.ne.s32.totalorder %s1020_s8, %s751_s25  ;;  %s756_s14 = sshll.u32 %s875_s28, 4  ;;  %s757_s14 = int_to_ptr.vmem [resolvable:$false] %s756_s14 }
  0x4a   : > { %s758_s20 = scalar_lea.vmem %s757_s14, 256  ;;  %p759_p3 = scmp.lt.s32.totalorder %s1020_s8, %s757_s14 }
  0x4b   : > { %p754_p10 = pnand %p752_p8, %p738_p0  ;;  %p760_p7 = scmp.lt.s32.totalorder %s758_s20, %s751_s25 }
  0x4d   : > { %p755_p13 = pneg %p754_p10  ;;  %p761_p9 = por %p760_p7, %p759_p3 }
  0x4f   : > { %p762_p1 = pnand %p761_p9, %p755_p13 }
  0x51   : > { %765 = shalt.err (!%p762_p1)
}
  0x52   : > { %s876_s11 = smov 64   ;;  %s877_s5 = smov 4  }
  0x53   : > { %627 = dma.hbm_to_vmem [thread:$0]  (!%p1016_p11), %s1014_s29, 128, %s1020_s8, %s178_s10, %s876_s11, %s876_s11, %s877_s5  }
  0x54   : > { %s198_s6 = sand.u32 1, %s870_s18   ;;  %s577_s7 = sshll.u32 %s1007_s26, 4 }
  0x55   : > { %s608_s28 = sshll.u32 %s870_s18, 8  ;;  %s202_s25 = scalar_lea.vmem [#allocation5], %s577_s7 }
  0x56   : > { %s209_s14 = sshll.u32 %s202_s25, 4  ;;  %s1056_s13 = scalar_lea.hbm %s1175_s1, %s608_s28  ;;  %s1058_s14 = int_to_ptr.vmem [resolvable:$true] %s209_s14 }
  0x57   : > { %s1060_s0 = scalar_lea.sflag [#allocation6], %s198_s6  ;;  %s766_s2 = scalar_lea.hbm %s1056_s13, 256 }
  0x58   : > { %p767_p5 = scmp.ne.s32.totalorder %s1056_s13, %s766_s2  ;;  %s771_s12 = scalar_lea.hbm %s1175_s1, 512 }
  0x59   : > { %p772_p6 = scmp.lt.u32.totalorder %s1056_s13, %s1175_s1  ;;  %p773_p8 = scmp.lt.u32.totalorder %s771_s12, %s766_s2 }
  0x5a   : > { %p769_p2 = pnand %p767_p5, %p738_p0  ;;  %p775_p13 = scmp.lt.u32.totalorder %s766_s2, %s1056_s13 }
  0x5b   : > { %p774_p10 = por %p773_p8, %p772_p6 }
  0x5c   : > { %p770_p4 = pneg %p769_p2 }
  0x5d   : > { %p776_p3 = por %p775_p13, %p774_p10 }
  0x5f   : > { %p777_p7 = pnand %p776_p3, %p770_p4 }
  0x61   : > { %780 = shalt.err (!%p777_p7)
}
  0x62   : > { %s781_s11 = scalar_lea.vmem %s1058_s14, 256  ;;  %s878_s5 = smov [#allocation5]  }
  0x63   : > { %p782_p9 = scmp.ne.s32.totalorder %s1058_s14, %s781_s11  ;;  %s786_s6 = sshll.u32 %s878_s5, 4  ;;  %s787_s6 = int_to_ptr.vmem [resolvable:$false] %s786_s6 }
  0x64   : > { %s788_s7 = scalar_lea.vmem %s787_s6, 512  ;;  %p789_p2 = scmp.lt.s32.totalorder %s1058_s14, %s787_s6 }
  0x65   : > { %p784_p1 = pnand %p782_p9, %p738_p0  ;;  %p790_p6 = scmp.lt.s32.totalorder %s788_s7, %s781_s11 }
  0x67   : > { %p785_p5 = pneg %p784_p1  ;;  %p791_p8 = por %p790_p6, %p789_p2 }
  0x69   : > { %p792_p10 = pnand %p791_p8, %p785_p5 }
  0x6b   : > { %795 = shalt.err (!%p792_p10)
}
  0x6c   : > { %s1195_s2 = smov 8   ;;  %s1196_s28 = smov 128  }
  0x6d   : > { %630 = dma.hbm_to_vmem [thread:$0]  (!%p1016_p11), %s1056_s13, 256, %s1058_s14, %s1060_s0, %s1196_s28, %s1196_s28, %s1195_s2  }
  0x6e   : > { %p1197_p0 = scmp.ne.s32.totalorder %s1188_s23, 0 }
  0x6f   : > { %s1092_s25 = sand.u32 (!%p1197_p0), 1, %s862_s16   ;;  %p1198_p4 = scmp.ne.s32.totalorder (!%p1197_p0), %s1186_s21, 0 }
  0x70   : > { %221 = sbr.rel (%p1197_p0) target bundleno = 412 (0x19c), region = 36  ;;  %s581_s20 = sshll.u32 (!%p1197_p0), %s1092_s25, 3 }
  0x71   : > { %s224_s26 = scalar_lea.sflag (!%p1197_p0), [#allocation3], %s1092_s25  ;;  %s1096_s29 = scalar_lea.vmem (!%p1197_p0), [#allocation2], %s581_s20 }
  0x77   : > { %841 = dma.done.wait (%p1198_p4), %s224_s26, 128  }
  0x78   : > { %843 = vsyncadd (%p1198_p4), %s224_s26, 4294967168  ;;  %s232_s0 = sand.u32 1, %s929_s19   ;;  %s582_s23 = sshll.u32 %s1092_s25, 4 }
  0x79   : > { %s233_s13 = scalar_lea.sflag [#allocation6], %s232_s0  ;;  %s1106_s9 = scalar_lea.vmem [#allocation5], %s582_s23 }
  0x7a   : > { %845 = dma.done.wait (%p1198_p4), %s233_s13, 256  }
  0x7b   : > { %847 = vsyncadd (%p1198_p4), %s233_s13, 4294967040  ;;  %p1199_p11 = scmp.eq.s32.totalorder %s929_s19, 0 }
  0x7d   : > { %849 = dma.done.wait (%p1199_p11), [#allocation6], 2048   ;;  %p1200_p13 = pmov %p1199_p11 }
  0x7e   : > { %v879_v0 = vmov 0   ;;  %v679_v1 = vld [vmem:[#allocation7 + $0x4] ss:$8 sps:$4 sm:$0xff]   ;;  %v681_v2 = vld [vmem:[#allocation7] ss:$8 sps:$4 sm:$0xff]   ;;  %v703_v17 = vld [vmem:[%s1096_s29] sm:$0xff]   ;;  %v294_v18 = vlaneseq }
  0x7f   : > { %851 = vsyncadd (%p1200_p13), [#allocation6], 4294965248  ;;  %422 = vmatprep.mubr.bf16.mxu0 %v879_v0  ;;  %390 = vmatprep.subr.bf16.mxu0 %v679_v1  ;;  %v682_v3 = vld [vmem:[#allocation7 + $0x14] ss:$8 sps:$4 sm:$0xff]   ;;  %v684_v4 = vld [vmem:[#allocation7 + $0x10] ss:$8 sps:$4 sm:$0xff]  }
  0x80   : > { %391 = vmatpush1.bf16.msra.mxu0 %v681_v2  ;;  %v685_v5 = vld [vmem:[#allocation7 + $0x24] ss:$8 sps:$4 sm:$0xff]   ;;  %v687_v6 = vld [vmem:[#allocation7 + $0x20] ss:$8 sps:$4 sm:$0xff]   ;;  %v688_v7 = vld [vmem:[#allocation7 + $0x34] ss:$8 sps:$4 sm:$0xff]  }
  0x81   : > { %392 = vmatprep.subr.bf16.mxu0 %v682_v3  ;;  %v690_v8 = vld [vmem:[#allocation7 + $0x30] ss:$8 sps:$4 sm:$0xff]   ;;  %v691_v9 = vld [vmem:[#allocation7 + $0x44] ss:$8 sps:$4 sm:$0xff]   ;;  %v693_v10 = vld [vmem:[#allocation7 + $0x40] ss:$8 sps:$4 sm:$0xff]  }
  0x82   : > { %v694_v11 = vld [vmem:[#allocation7 + $0x54] ss:$8 sps:$4 sm:$0xff]   ;;  %v696_v12 = vld [vmem:[#allocation7 + $0x50] ss:$8 sps:$4 sm:$0xff]   ;;  %v697_v13 = vld [vmem:[#allocation7 + $0x64] ss:$8 sps:$4 sm:$0xff]  }
  0x83   : > { %v699_v14 = vld [vmem:[#allocation7 + $0x60] ss:$8 sps:$4 sm:$0xff]   ;;  %v700_v15 = vld [vmem:[#allocation7 + $0x74] ss:$8 sps:$4 sm:$0xff]   ;;  %v702_v16 = vld [vmem:[#allocation7 + $0x70] ss:$8 sps:$4 sm:$0xff]  }
  0x84   : > { %393 = vmatpush1.bf16.msra.mxu0 %v684_v4  ;;  %v295_v19 = vshrl.u32 %v294_v18, 7  ;;  %v292_v21 = vld [vmem:[%s1177_s3] sm:$0x3]  ;;  %v442_v39 = vld [vmem:[%s1106_s9 + $0x8] sm:$0xff]  ;;  %s609_s12 = sshll.u32 %s929_s19, 8  ;;  %s269_s8 = scalar_lea.vmem [#allocation8], %s582_s23 }
  0x85   : > { %394 = vmatprep.subr.bf16.mxu0 %v685_v5  ;;  %v441_v35 = vld [vmem:[%s1106_s9] sm:$0xff]  ;;  %s465_s10 = sshll.u32 %s269_s8, 4  ;;  %s1128_s6 = scalar_lea.hbm %s1178_s4, %s609_s12  ;;  %s1130_s10 = int_to_ptr.vmem [resolvable:$true] %s465_s10 }
  0x86   : > { %v300_v20 = vsub.s32 1, %v295_v19  ;;  %v296_v31 = vsub.s32 0, %v295_v19  ;;  %s452_s7 = scalar_lea.sflag [#allocation4], %s1092_s25  ;;  %s796_s19 = scalar_lea.vmem %s1130_s10, 256 }
  0x87   : > { %p797_p3 = scmp.ne.s32.totalorder %s1130_s10, %s796_s19  ;;  %s880_s2 = smov [#allocation8]  }
  0x88   : > { %395 = vmatpush1.bf16.msra.mxu0 %v687_v6  ;;  %v301_v22 = vrot.slane %v292_v21, %v300_v20  ;;  %v297_v32 = vrot.slane %v292_v21, %v296_v31  ;;  %s800_s28 = sshll.u32 %s880_s2, 4  ;;  %s801_s28 = int_to_ptr.vmem [resolvable:$false] %s800_s28 }
  0x89   : > { %396 = vmatprep.subr.bf16.mxu0 %v688_v7  ;;  %p798_p7 = pnand %p797_p3, %p1002_p12  ;;  %s802_s20 = scalar_lea.vmem %s801_s28, 512 }
  0x8a   : > { %p803_p1 = scmp.lt.s32.totalorder %s1130_s10, %s801_s28  ;;  %p804_p5 = scmp.lt.s32.totalorder %s802_s20, %s796_s19 }
  0x8b   : > { %p799_p9 = pneg %p798_p7 }
  0x8c   : > { %397 = vmatpush1.bf16.msra.mxu0 %v690_v8  ;;  %p805_p2 = por %p804_p5, %p803_p1 }
  0x8d   : > { %398 = vmatprep.subr.bf16.mxu0 %v691_v9 }
  0x8e   : > { %p806_p6 = pnand %p805_p2, %p799_p9 }
  0x90   : > { %399 = vmatpush1.bf16.msra.mxu0 %v693_v10 }
  0x91   : > { %400 = vmatprep.subr.bf16.mxu0 %v694_v11 }
  0x94   : > { %401 = vmatpush1.bf16.msra.mxu0 %v696_v12 }
  0x95   : > { %402 = vmatprep.subr.bf16.mxu0 %v697_v13 }
  0x98   : > { %403 = vmatpush1.bf16.msra.mxu0 %v699_v14 }
  0x99   : > { %404 = vmatprep.subr.bf16.mxu0 %v700_v15 }
  0x9c   : > { %405 = vmatpush1.bf16.msra.mxu0 %v702_v16 }
  0x9f   : > { %423 = vmatmul.mubr.bf16.vlgmr.msra.gmra.mrb[0].mxu0 %v703_v17 }
 0x172   : > { %v424_v23 = vpop.f32.mrb[0].mxu0 }
 0x173   : > { %v426_v24 = vpop.f32.mrb[1].mxu0  ;;  %v425_v33 = vadd.f32 %v424_v23, %v297_v32 }
 0x174   : > { %v427_v25 = vadd.f32 %v426_v24, %v301_v22  ;;  %v428_v26 = vpop.f32.mrb[2].mxu0 }
 0x175   : > { %v430_v27 = vpop.f32.mrb[3].mxu0  ;;  %v429_v37 = vadd.f32 %v428_v26, %v297_v32  ;;  %v443_v40 = vsub.f32 %v441_v35, %v425_v33 }
 0x176   : > { %v433_v28 = vmul.f32 0.5, %v427_v25  ;;  %v431_v29 = vadd.f32 %v430_v27, %v301_v22 }
 0x177   : > { %v444_v44 = vsub.f32 %v442_v39, %v429_v37 }
 0x178   : > { %704 = vtanh.f32 %v433_v28  ;;  %v434_v30 = vmul.f32 0.5, %v431_v29 }
 0x17a   : > { %706 = vtanh.f32 %v434_v30 }
 0x182   : > { %v705_v34 = vpop.eup %704 }
 0x183   : > { %v437_v36 = vadd.f32 1.0, %v705_v34 }
 0x184   : > { %v707_v38 = vpop.eup %706 }
 0x185   : > { %v439_v41 = vmul.f32 0.5, %v437_v36  ;;  %v438_v42 = vadd.f32 1.0, %v707_v38 }
 0x187   : > { %v445_v43 = vmul.f32 %v443_v40, %v439_v41  ;;  %v440_v45 = vmul.f32 0.5, %v438_v42 }
 0x189   : > { %v447_v46 = vadd.f32 %v445_v43, %v425_v33  ;;  %v446_v47 = vmul.f32 %v444_v44, %v440_v45 }
 0x18b   : > { %449 = vst [vmem:[%s269_s8] sm:$0xff] %v447_v46  ;;  %v448_v48 = vadd.f32 %v446_v47, %v429_v37 }
 0x18d   : > { %450 = vst [vmem:[%s269_s8 + $0x8] sm:$0xff] %v448_v48 }
 0x18e   : > { %809 = shalt.err (!%p806_p6)
}
 0x18f   : > { %s810_s26 = scalar_lea.hbm %s1128_s6, 256  ;;  %s814_s23 = scalar_lea.hbm %s1178_s4, 512 }
 0x190   : > { %p811_p8 = scmp.ne.s32.totalorder %s1128_s6, %s810_s26  ;;  %p815_p4 = scmp.lt.u32.totalorder %s1128_s6, %s1178_s4 }
 0x191   : > { %p816_p11 = scmp.lt.u32.totalorder %s814_s23, %s810_s26  ;;  %p818_p3 = scmp.lt.u32.totalorder %s810_s26, %s1128_s6 }
 0x192   : > { %p812_p10 = pnand %p811_p8, %p1002_p12 }
 0x193   : > { %p817_p13 = por %p816_p11, %p815_p4 }
 0x194   : > { %p813_p0 = pneg %p812_p10 }
 0x195   : > { %p819_p7 = por %p818_p3, %p817_p13 }
 0x197   : > { %p820_p9 = pnand %p819_p7, %p813_p0 }
 0x199   : > { %823 = shalt.err (!%p820_p9)
}
 0x19a   : > { %s881_s21 = smov 128   ;;  %s882_s14 = smov 8  }
 0x19b   : > { %618 = dma.vmem_to_hbm [thread:$0]  (%p1002_p12), %s1130_s10, 256, %s1128_s6, %s452_s7, %s881_s21, %s881_s21, %s882_s14  }
 0x19c PF: > { %s480_s12 = sand.u32 1, %s858_s15   ;;  %p1201_p1 = scmp.ne.s32.totalorder %s1187_s22, 0 }
 0x19d   : > { %p1202_p5 = scmp.ge.s32.totalorder %s870_s18, 2  ;;  %s481_s8 = scalar_lea.sflag [#allocation4], %s480_s12 }
 0x19f   : > { %p632_p2 = pnand %p1202_p5, %p1201_p1 }
 0x1a1   : > { %853 = dma.done.wait (!%p632_p2), %s481_s8, 256  }
 0x1a2   : > { %855 = vsyncadd (!%p632_p2), %s481_s8, 4294967040  ;;  %p20_p6 = scmp.ge.s32.totalorder %s964_s27, 4   ;;  %s1203_s15 = smov %s862_s16 }
 0x1a3   : > { %s1204_s16 = smov %s866_s17  ;;  %s1205_s17 = smov %s998_s24 }
 0x1a4   : > { %s1206_s18 = smov %s964_s27  ;;  %22 = sbr.rel (!%p20_p6) target bundleno = 10 (0xa), region = 98 }
 0x1ab   :  { %486 = vsyncpa [#allocation3], 1 }
 0x1ac   :  { %488 = vsyncpa [#allocation3 + $0x1], 1 }
 0x1ad   :  { %489 = vsyncpa [#allocation6], 1 }
 0x1ae   :  { %491 = vsyncpa [#allocation6 + $0x1], 1 }
 0x1af   :  { %492 = vsyncpa [#allocation4], 1 }
 0x1b0   :  { %494 = vsyncpa [#allocation4 + $0x1], 1 }

// kernel: tpu_custom_call.1
= control target key start
LH: loop header
LB: loop body
LE: loop exit
PB: predicated region body
PF: predicated region fallthrough
CT: control target
= control target key end

     0   :  { %s1174_s0 = inlined_call_operand.hbm [shape: bf16[32,128], index: 0, kind: input, shape index: {}]   ;;  %s1175_s1 = inlined_call_operand.hbm [shape: f32[32,128], index: 1, kind: input, shape index: {}]   ;;  %s1176_s2 = inlined_call_operand.hbm [shape: bf16[128,256], index: 2, kind: input, shape index: {}]   ;;  %s1177_s3 = inlined_call_operand.vmem [shape: f32[1,256], index: 3, kind: input, shape index: {}]   ;;  %s1178_s4 = inlined_call_operand.hbm [shape: f32[32,128], index: 4, kind: output, shape index: {}]  }
   0x1   :  { %1184 = sst [smem:[#allocation13_spill]] %s1174_s0 }
   0x2   :  { %1185 = sst [smem:[#allocation14_spill]] %s1176_s2 }
   0x3   :  { %9 = vsyncpa [#allocation3], 0 }
   0x4   :  { %11 = vsyncpa [#allocation3 + $0x1], 0 }
   0x5   :  { %12 = vsyncpa [#allocation6], 0 }
   0x6   :  { %14 = vsyncpa [#allocation6 + $0x1], 0 }
   0x7   :  { %15 = vsyncpa [#allocation4], 0 }
   0x8   :  { %17 = vsyncpa [#allocation4 + $0x1], 0  ;;  %s908_s15 = smov 0   ;;  %s910_s16 = smov 0  }
   0x9   :  { %s912_s17 = smov 0   ;;  %s914_s18 = smov 0  }
   0xa LB: > { %s929_s19 = sadd.s32 4294967295, %s870_s18   ;;  %s570_s20 = sadd.s32 4294967294, %s870_s18   ;;  %s870_s18 = sphi %s914_s18, %s1206_s18   ;;  %s866_s17 = sphi %s912_s17, %s1205_s17   ;;  %s862_s16 = sphi %s910_s16, %s1204_s16   ;;  %s858_s15 = sphi %s908_s15, %s1203_s15  }
   0xb   : > { %p43_p0 = scmp.ne.s32.totalorder %s862_s16, %s858_s15  ;;  %p1179_p1 = scmp.eq.s32.totalorder %s929_s19, 0 }
   0xc   : > { %p141_p3 = scmp.eq.s32.totalorder %s570_s20, 1  ;;  %p571_p5 = scmp.ge.s32.totalorder %s870_s18, 1 }
   0xd   : > { %p938_p4 = por %p1179_p1, %p43_p0  ;;  %p148_p7 = scmp.lt.s32.totalorder %s870_s18, 3 }
   0xe   : > { %p943_p6 = por %p141_p3, %p43_p0  ;;  %s872_s24 = smov [#allocation7]  }
   0xf   : > { %s1186_s21 = scalar_select %p938_p4, 1, 0 }
  0x10   : > { %s1187_s22 = scalar_select %p943_p6, 1, 0 }
  0x11   : > { %p948_p8 = pnand %p571_p5, %p148_p7  ;;  %s160_s25 = sshll.u32 %s872_s24, 4  ;;  %s952_s25 = int_to_ptr.vmem [resolvable:$true] %s160_s25 }
  0x12   : > { %s964_s27 = sadd.s32 1, %s870_s18   ;;  %s30_s28 = sadd.s32 1, %s866_s17 }
  0x13   : > { %s1188_s23 = scalar_select %p948_p8, 1, 0 }
  0x14   : > { %p620_p9 = pneg %p948_p8  ;;  %s27_s29 = ssub.s32 %s870_s18, %s964_s27 }
  0x15   : > { %s1190_s2 = sld [smem:[#allocation14_spill]] }
  0x16   : > { %p959_p11 = pnand %p620_p9, %p1179_p1 }
  0x18   : > { %p710_p13 = pneg %p959_p11 }
  0x1b   : > { %s708_s6 = scalar_lea.hbm %s1190_s2, 2048 }
  0x1c   : > { %p709_p12 = scmp.ne.s32.totalorder %s1190_s2, %s708_s6  ;;  %p715_p5 = scmp.lt.u32.totalorder %s708_s6, %s1190_s2 }
  0x1e   : > { %p711_p0 = pnand %p710_p13, %p709_p12 }
  0x20   : > { %p712_p3 = pneg %p711_p0 }
  0x22   : > { %p717_p7 = pnand %p715_p5, %p712_p3 }
  0x24   : > { %720 = shalt.err (!%p717_p7)
}
  0x25   : > { %s721_s11 = scalar_lea.vmem %s952_s25, 2048  ;;  %p729_p2 = scmp.lt.s32.totalorder %s952_s25, %s952_s25 }
  0x26   : > { %p722_p9 = scmp.ne.s32.totalorder %s952_s25, %s721_s11  ;;  %p730_p6 = scmp.lt.s32.totalorder %s721_s11, %s721_s11 }
  0x28   : > { %p724_p10 = pnand %p722_p9, %p710_p13  ;;  %p731_p4 = por %p730_p6, %p729_p2 }
  0x2a   : > { %p725_p1 = pneg %p724_p10 }
  0x2c   : > { %p732_p8 = pnand %p731_p4, %p725_p1 }
  0x2e   : > { %735 = shalt.err (!%p732_p8)
}
  0x2f   : > { %s1182_s12 = smov 128   ;;  %s1183_s13 = smov 8  }
  0x30   : > { %623 = dma.hbm_to_vmem [thread:$0]  (!%p959_p11), %s1190_s2, 2048, %s952_s25, [#allocation6], %s1182_s12, %s1182_s12, %s1183_s13  }
  0x31   : > { %p28_p1 = scmp.eq.s32.totalorder %s27_s29, 0  ;;  %p37_p2 = scmp.ne.s32.totalorder %s866_s17, %s862_s16 }
  0x32   : > { %p38_p4 = scmp.eq.s32.totalorder %s870_s18, 0  ;;  %p636_p6 = scmp.lt.s32.totalorder %s870_s18, 2 }
  0x33   : > { %s998_s24 = scalar_select %p28_p1, %s866_s17, %s30_s28  }
  0x34   : > { %p39_p8 = por %p38_p4, %p37_p2  ;;  %p1191_p10 = scmp.eq.s32.totalorder %s929_s19, 1 }
  0x35   : > { %s1007_s26 = sand.u32 1, %s866_s17   ;;  %s607_s5 = sshll.u32 %s870_s18, 7 }
  0x36   : > { %p1002_p12 = por %p1191_p10, %p37_p2  ;;  %s574_s6 = sshll.u32 %s1007_s26, 3 }
  0x37   : > { %s1193_s0 = sld [smem:[#allocation13_spill]]  ;;  %s181_s28 = scalar_lea.vmem [#allocation2], %s574_s6 }
  0x38   : > { %s188_s8 = sshll.u32 %s181_s28, 4  ;;  %p1016_p11 = pnand %p636_p6, %p39_p8  ;;  %s1020_s8 = int_to_ptr.vmem [resolvable:$true] %s188_s8 }
  0x39   : > { %s178_s10 = scalar_lea.sflag [#allocation3], %s1007_s26 }
  0x3a   : > { %p738_p0 = pneg %p1016_p11 }
  0x3d   : > { %s1014_s29 = scalar_lea.hbm %s1193_s0, %s607_s5  ;;  %s741_s5 = scalar_lea.hbm %s1193_s0, 256 }
  0x3e   : > { %s736_s11 = scalar_lea.hbm %s1014_s29, 128  ;;  %p742_p7 = scmp.lt.u32.totalorder %s1014_s29, %s1193_s0 }
  0x3f   : > { %p737_p13 = scmp.ne.s32.totalorder %s1014_s29, %s736_s11  ;;  %p743_p9 = scmp.lt.u32.totalorder %s741_s5, %s736_s11 }
  0x40   : > { %p745_p2 = scmp.lt.u32.totalorder %s736_s11, %s1014_s29 }
  0x41   : > { %p739_p3 = pnand %p738_p0, %p737_p13  ;;  %p744_p1 = por %p743_p9, %p742_p7 }
  0x43   : > { %p740_p5 = pneg %p739_p3  ;;  %p746_p4 = por %p745_p2, %p744_p1 }
  0x45   : > { %p747_p6 = pnand %p746_p4, %p740_p5 }
  0x47   : > { %750 = shalt.err (!%p747_p6)
}
  0x48   : > { %s751_s25 = scalar_lea.vmem %s1020_s8, 128  ;;  %s875_s28 = smov [#allocation2]  }
  0x49   : > { %p752_p8 = scmp.ne.s32.totalorder %s1020_s8, %s751_s25  ;;  %s756_s14 = sshll.u32 %s875_s28, 4  ;;  %s757_s14 = int_to_ptr.vmem [resolvable:$false] %s756_s14 }
  0x4a   : > { %s758_s20 = scalar_lea.vmem %s757_s14, 256  ;;  %p759_p3 = scmp.lt.s32.totalorder %s1020_s8, %s757_s14 }
  0x4b   : > { %p754_p10 = pnand %p752_p8, %p738_p0  ;;  %p760_p7 = scmp.lt.s32.totalorder %s758_s20, %s751_s25 }
  0x4d   : > { %p755_p13 = pneg %p754_p10  ;;  %p761_p9 = por %p760_p7, %p759_p3 }
  0x4f   : > { %p762_p1 = pnand %p761_p9, %p755_p13 }
  0x51   : > { %765 = shalt.err (!%p762_p1)
}
  0x52   : > { %s876_s11 = smov 64   ;;  %s877_s5 = smov 4  }
  0x53   : > { %627 = dma.hbm_to_vmem [thread:$0]  (!%p1016_p11), %s1014_s29, 128, %s1020_s8, %s178_s10, %s876_s11, %s876_s11, %s877_s5  }
  0x54   : > { %s198_s6 = sand.u32 1, %s870_s18   ;;  %s577_s7 = sshll.u32 %s1007_s26, 4 }
  0x55   : > { %s608_s28 = sshll.u32 %s870_s18, 8  ;;  %s202_s25 = scalar_lea.vmem [#allocation5], %s577_s7 }
  0x56   : > { %s209_s14 = sshll.u32 %s202_s25, 4  ;;  %s1056_s13 = scalar_lea.hbm %s1175_s1, %s608_s28  ;;  %s1058_s14 = int_to_ptr.vmem [resolvable:$true] %s209_s14 }
  0x57   : > { %s1060_s0 = scalar_lea.sflag [#allocation6], %s198_s6  ;;  %s766_s2 = scalar_lea.hbm %s1056_s13, 256 }
  0x58   : > { %p767_p5 = scmp.ne.s32.totalorder %s1056_s13, %s766_s2  ;;  %s771_s12 = scalar_lea.hbm %s1175_s1, 512 }
  0x59   : > { %p772_p6 = scmp.lt.u32.totalorder %s1056_s13, %s1175_s1  ;;  %p773_p8 = scmp.lt.u32.totalorder %s771_s12, %s766_s2 }
  0x5a   : > { %p769_p2 = pnand %p767_p5, %p738_p0  ;;  %p775_p13 = scmp.lt.u32.totalorder %s766_s2, %s1056_s13 }
  0x5b   : > { %p774_p10 = por %p773_p8, %p772_p6 }
  0x5c   : > { %p770_p4 = pneg %p769_p2 }
  0x5d   : > { %p776_p3 = por %p775_p13, %p774_p10 }
  0x5f   : > { %p777_p7 = pnand %p776_p3, %p770_p4 }
  0x61   : > { %780 = shalt.err (!%p777_p7)
}
  0x62   : > { %s781_s11 = scalar_lea.vmem %s1058_s14, 256  ;;  %s878_s5 = smov [#allocation5]  }
  0x63   : > { %p782_p9 = scmp.ne.s32.totalorder %s1058_s14, %s781_s11  ;;  %s786_s6 = sshll.u32 %s878_s5, 4  ;;  %s787_s6 = int_to_ptr.vmem [resolvable:$false] %s786_s6 }
  0x64   : > { %s788_s7 = scalar_lea.vmem %s787_s6, 512  ;;  %p789_p2 = scmp.lt.s32.totalorder %s1058_s14, %s787_s6 }
  0x65   : > { %p784_p1 = pnand %p782_p9, %p738_p0  ;;  %p790_p6 = scmp.lt.s32.totalorder %s788_s7, %s781_s11 }
  0x67   : > { %p785_p5 = pneg %p784_p1  ;;  %p791_p8 = por %p790_p6, %p789_p2 }
  0x69   : > { %p792_p10 = pnand %p791_p8, %p785_p5 }
  0x6b   : > { %795 = shalt.err (!%p792_p10)
}
  0x6c   : > { %s1195_s2 = smov 8   ;;  %s1196_s28 = smov 128  }
  0x6d   : > { %630 = dma.hbm_to_vmem [thread:$0]  (!%p1016_p11), %s1056_s13, 256, %s1058_s14, %s1060_s0, %s1196_s28, %s1196_s28, %s1195_s2  }
  0x6e   : > { %p1197_p0 = scmp.ne.s32.totalorder %s1188_s23, 0 }
  0x6f   : > { %s1092_s25 = sand.u32 (!%p1197_p0), 1, %s862_s16   ;;  %p1198_p4 = scmp.ne.s32.totalorder (!%p1197_p0), %s1186_s21, 0 }
  0x70   : > { %221 = sbr.rel (%p1197_p0) target bundleno = 412 (0x19c), region = 36  ;;  %s581_s20 = sshll.u32 (!%p1197_p0), %s1092_s25, 3 }
  0x71   : > { %s224_s26 = scalar_lea.sflag (!%p1197_p0), [#allocation3], %s1092_s25  ;;  %s1096_s29 = scalar_lea.vmem (!%p1197_p0), [#allocation2], %s581_s20 }
  0x77   : > { %841 = dma.done.wait (%p1198_p4), %s224_s26, 128  }
  0x78   : > { %843 = vsyncadd (%p1198_p4), %s224_s26, 4294967168  ;;  %s232_s0 = sand.u32 1, %s929_s19   ;;  %s582_s23 = sshll.u32 %s1092_s25, 4 }
  0x79   : > { %s233_s13 = scalar_lea.sflag [#allocation6], %s232_s0  ;;  %s1106_s9 = scalar_lea.vmem [#allocation5], %s582_s23 }
  0x7a   : > { %845 = dma.done.wait (%p1198_p4), %s233_s13, 256  }
  0x7b   : > { %847 = vsyncadd (%p1198_p4), %s233_s13, 4294967040  ;;  %p1199_p11 = scmp.eq.s32.totalorder %s929_s19, 0 }
  0x7d   : > { %849 = dma.done.wait (%p1199_p11), [#allocation6], 2048   ;;  %p1200_p13 = pmov %p1199_p11 }
  0x7e   : > { %v879_v0 = vmov 0   ;;  %v679_v1 = vld [vmem:[#allocation7 + $0x4] ss:$8 sps:$4 sm:$0xff]   ;;  %v681_v2 = vld [vmem:[#allocation7] ss:$8 sps:$4 sm:$0xff]   ;;  %v703_v17 = vld [vmem:[%s1096_s29] sm:$0xff]   ;;  %v294_v18 = vlaneseq }
  0x7f   : > { %851 = vsyncadd (%p1200_p13), [#allocation6], 4294965248  ;;  %422 = vmatprep.mubr.bf16.mxu0 %v879_v0  ;;  %390 = vmatprep.subr.bf16.mxu0 %v679_v1  ;;  %v682_v3 = vld [vmem:[#allocation7 + $0x14] ss:$8 sps:$4 sm:$0xff]   ;;  %v684_v4 = vld [vmem:[#allocation7 + $0x10] ss:$8 sps:$4 sm:$0xff]  }
  0x80   : > { %391 = vmatpush1.bf16.msra.mxu0 %v681_v2  ;;  %v685_v5 = vld [vmem:[#allocation7 + $0x24] ss:$8 sps:$4 sm:$0xff]   ;;  %v687_v6 = vld [vmem:[#allocation7 + $0x20] ss:$8 sps:$4 sm:$0xff]   ;;  %v688_v7 = vld [vmem:[#allocation7 + $0x34] ss:$8 sps:$4 sm:$0xff]  }
  0x81   : > { %392 = vmatprep.subr.bf16.mxu0 %v682_v3  ;;  %v690_v8 = vld [vmem:[#allocation7 + $0x30] ss:$8 sps:$4 sm:$0xff]   ;;  %v691_v9 = vld [vmem:[#allocation7 + $0x44] ss:$8 sps:$4 sm:$0xff]   ;;  %v693_v10 = vld [vmem:[#allocation7 + $0x40] ss:$8 sps:$4 sm:$0xff]  }
  0x82   : > { %v694_v11 = vld [vmem:[#allocation7 + $0x54] ss:$8 sps:$4 sm:$0xff]   ;;  %v696_v12 = vld [vmem:[#allocation7 + $0x50] ss:$8 sps:$4 sm:$0xff]   ;;  %v697_v13 = vld [vmem:[#allocation7 + $0x64] ss:$8 sps:$4 sm:$0xff]  }
  0x83   : > { %v699_v14 = vld [vmem:[#allocation7 + $0x60] ss:$8 sps:$4 sm:$0xff]   ;;  %v700_v15 = vld [vmem:[#allocation7 + $0x74] ss:$8 sps:$4 sm:$0xff]   ;;  %v702_v16 = vld [vmem:[#allocation7 + $0x70] ss:$8 sps:$4 sm:$0xff]  }
  0x84   : > { %393 = vmatpush1.bf16.msra.mxu0 %v684_v4  ;;  %v295_v19 = vshrl.u32 %v294_v18, 7  ;;  %v292_v21 = vld [vmem:[%s1177_s3] sm:$0x3]  ;;  %v442_v39 = vld [vmem:[%s1106_s9 + $0x8] sm:$0xff]  ;;  %s609_s12 = sshll.u32 %s929_s19, 8  ;;  %s269_s8 = scalar_lea.vmem [#allocation8], %s582_s23 }
  0x85   : > { %394 = vmatprep.subr.bf16.mxu0 %v685_v5  ;;  %v441_v35 = vld [vmem:[%s1106_s9] sm:$0xff]  ;;  %s465_s10 = sshll.u32 %s269_s8, 4  ;;  %s1128_s6 = scalar_lea.hbm %s1178_s4, %s609_s12  ;;  %s1130_s10 = int_to_ptr.vmem [resolvable:$true] %s465_s10 }
  0x86   : > { %v300_v20 = vsub.s32 1, %v295_v19  ;;  %v296_v31 = vsub.s32 0, %v295_v19  ;;  %s452_s7 = scalar_lea.sflag [#allocation4], %s1092_s25  ;;  %s796_s19 = scalar_lea.vmem %s1130_s10, 256 }
  0x87   : > { %p797_p3 = scmp.ne.s32.totalorder %s1130_s10, %s796_s19  ;;  %s880_s2 = smov [#allocation8]  }
  0x88   : > { %395 = vmatpush1.bf16.msra.mxu0 %v687_v6  ;;  %v301_v22 = vrot.slane %v292_v21, %v300_v20  ;;  %v297_v32 = vrot.slane %v292_v21, %v296_v31  ;;  %s800_s28 = sshll.u32 %s880_s2, 4  ;;  %s801_s28 = int_to_ptr.vmem [resolvable:$false] %s800_s28 }
  0x89   : > { %396 = vmatprep.subr.bf16.mxu0 %v688_v7  ;;  %p798_p7 = pnand %p797_p3, %p1002_p12  ;;  %s802_s20 = scalar_lea.vmem %s801_s28, 512 }
  0x8a   : > { %p803_p1 = scmp.lt.s32.totalorder %s1130_s10, %s801_s28  ;;  %p804_p5 = scmp.lt.s32.totalorder %s802_s20, %s796_s19 }
  0x8b   : > { %p799_p9 = pneg %p798_p7 }
  0x8c   : > { %397 = vmatpush1.bf16.msra.mxu0 %v690_v8  ;;  %p805_p2 = por %p804_p5, %p803_p1 }
  0x8d   : > { %398 = vmatprep.subr.bf16.mxu0 %v691_v9 }
  0x8e   : > { %p806_p6 = pnand %p805_p2, %p799_p9 }
  0x90   : > { %399 = vmatpush1.bf16.msra.mxu0 %v693_v10 }
  0x91   : > { %400 = vmatprep.subr.bf16.mxu0 %v694_v11 }
  0x94   : > { %401 = vmatpush1.bf16.msra.mxu0 %v696_v12 }
  0x95   : > { %402 = vmatprep.subr.bf16.mxu0 %v697_v13 }
  0x98   : > { %403 = vmatpush1.bf16.msra.mxu0 %v699_v14 }
  0x99   : > { %404 = vmatprep.subr.bf16.mxu0 %v700_v15 }
  0x9c   : > { %405 = vmatpush1.bf16.msra.mxu0 %v702_v16 }
  0x9f   : > { %423 = vmatmul.mubr.bf16.vlgmr.msra.gmra.mrb[0].mxu0 %v703_v17 }
 0x172   : > { %v424_v23 = vpop.f32.mrb[0].mxu0 }
 0x173   : > { %v426_v24 = vpop.f32.mrb[1].mxu0  ;;  %v425_v33 = vadd.f32 %v424_v23, %v297_v32 }
 0x174   : > { %v427_v25 = vadd.f32 %v426_v24, %v301_v22  ;;  %v428_v26 = vpop.f32.mrb[2].mxu0 }
 0x175   : > { %v430_v27 = vpop.f32.mrb[3].mxu0  ;;  %v429_v37 = vadd.f32 %v428_v26, %v297_v32  ;;  %v443_v40 = vsub.f32 %v441_v35, %v425_v33 }
 0x176   : > { %v433_v28 = vmul.f32 0.5, %v427_v25  ;;  %v431_v29 = vadd.f32 %v430_v27, %v301_v22 }
 0x177   : > { %v444_v44 = vsub.f32 %v442_v39, %v429_v37 }
 0x178   : > { %704 = vtanh.f32 %v433_v28  ;;  %v434_v30 = vmul.f32 0.5, %v431_v29 }
 0x17a   : > { %706 = vtanh.f32 %v434_v30 }
 0x182   : > { %v705_v34 = vpop.eup %704 }
 0x183   : > { %v437_v36 = vadd.f32 1.0, %v705_v34 }
 0x184   : > { %v707_v38 = vpop.eup %706 }
 0x185   : > { %v439_v41 = vmul.f32 0.5, %v437_v36  ;;  %v438_v42 = vadd.f32 1.0, %v707_v38 }
 0x187   : > { %v445_v43 = vmul.f32 %v443_v40, %v439_v41  ;;  %v440_v45 = vmul.f32 0.5, %v438_v42 }
 0x189   : > { %v447_v46 = vadd.f32 %v445_v43, %v425_v33  ;;  %v446_v47 = vmul.f32 %v444_v44, %v440_v45 }
 0x18b   : > { %449 = vst [vmem:[%s269_s8] sm:$0xff] %v447_v46  ;;  %v448_v48 = vadd.f32 %v446_v47, %v429_v37 }
 0x18d   : > { %450 = vst [vmem:[%s269_s8 + $0x8] sm:$0xff] %v448_v48 }
 0x18e   : > { %809 = shalt.err (!%p806_p6)
}
 0x18f   : > { %s810_s26 = scalar_lea.hbm %s1128_s6, 256  ;;  %s814_s23 = scalar_lea.hbm %s1178_s4, 512 }
 0x190   : > { %p811_p8 = scmp.ne.s32.totalorder %s1128_s6, %s810_s26  ;;  %p815_p4 = scmp.lt.u32.totalorder %s1128_s6, %s1178_s4 }
 0x191   : > { %p816_p11 = scmp.lt.u32.totalorder %s814_s23, %s810_s26  ;;  %p818_p3 = scmp.lt.u32.totalorder %s810_s26, %s1128_s6 }
 0x192   : > { %p812_p10 = pnand %p811_p8, %p1002_p12 }
 0x193   : > { %p817_p13 = por %p816_p11, %p815_p4 }
 0x194   : > { %p813_p0 = pneg %p812_p10 }
 0x195   : > { %p819_p7 = por %p818_p3, %p817_p13 }
 0x197   : > { %p820_p9 = pnand %p819_p7, %p813_p0 }
 0x199   : > { %823 = shalt.err (!%p820_p9)
}
 0x19a   : > { %s881_s21 = smov 128   ;;  %s882_s14 = smov 8  }
 0x19b   : > { %618 = dma.vmem_to_hbm [thread:$0]  (%p1002_p12), %s1130_s10, 256, %s1128_s6, %s452_s7, %s881_s21, %s881_s21, %s882_s14  }
 0x19c PF: > { %s480_s12 = sand.u32 1, %s858_s15   ;;  %p1201_p1 = scmp.ne.s32.totalorder %s1187_s22, 0 }
 0x19d   : > { %p1202_p5 = scmp.ge.s32.totalorder %s870_s18, 2  ;;  %s481_s8 = scalar_lea.sflag [#allocation4], %s480_s12 }
 0x19f   : > { %p632_p2 = pnand %p1202_p5, %p1201_p1 }
 0x1a1   : > { %853 = dma.done.wait (!%p632_p2), %s481_s8, 256  }
 0x1a2   : > { %855 = vsyncadd (!%p632_p2), %s481_s8, 4294967040  ;;  %p20_p6 = scmp.ge.s32.totalorder %s964_s27, 4   ;;  %s1203_s15 = smov %s862_s16 }
 0x1a3   : > { %s1204_s16 = smov %s866_s17  ;;  %s1205_s17 = smov %s998_s24 }
 0x1a4   : > { %s1206_s18 = smov %s964_s27  ;;  %22 = sbr.rel (!%p20_p6) target bundleno = 10 (0xa), region = 98 }
 0x1ab   :  { %486 = vsyncpa [#allocation3], 1 }
 0x1ac   :  { %488 = vsyncpa [#allocation3 + $0x1], 1 }
 0x1ad   :  { %489 = vsyncpa [#allocation6], 1 }
 0x1ae   :  { %491 = vsyncpa [#allocation6 + $0x1], 1 }
 0x1af   :  { %492 = vsyncpa [#allocation4], 1 }
 0x1b0   :  { %494 = vsyncpa [#allocation4 + $0x1], 1 }

</bundles_post_ra>
